<compile_context>
chip_gen: v5e
topology: v5e:2x2
jax: 0.10.0
libtpu: 0.0.40
codegen_flags: <defaults>
</compile_context>

<pallas_src>
import math

import jax
import jax.numpy as jnp
from jax.experimental import pallas as pl
from jax.experimental.pallas import tpu as pltpu


def _h_sigmoid_kernel(x_ref, o_ref):
    # relu6(x + 3) / 6  ==  clamp(x + 3, 0, 6) * (1/6)
    x = x_ref[...].astype(jnp.float32)
    y = jnp.minimum(jnp.maximum(x + 3.0, 0.0), 6.0) * (1.0 / 6.0)
    o_ref[...] = y.astype(o_ref.dtype)


def h_sigmoid(x, *, target_block_bytes=4 * 1024 * 1024,
              vmem_limit_bytes=48 * 1024 * 1024):
    """Elementwise hard-sigmoid relu6(x + 3) / 6 for any input shape/dtype."""
    orig_shape = x.shape
    dtype = x.dtype
    total = math.prod(orig_shape)
    if total == 0:
        return x

    itemsize = jnp.dtype(dtype).itemsize
    # Sublane packing: 8 rows per vreg tile for 32-bit, 16 for 16-bit, 32 for 8-bit.
    row_mult = 8 * max(1, 4 // itemsize)

    flat = jnp.ravel(x)

    # Prefer a lane-dense column width that divides `total` with sublane-aligned
    # rows -> no pad pass, no slice-back pass, ravel/reshape are free bitcasts.
    cols = None
    for c in (2048, 1024, 512, 256, 128):
        if total % c == 0 and (total // c) % row_mult == 0:
            cols = c
            break

    if cols is None and total % 128 == 0 and total * itemsize <= 2 * target_block_bytes:
        # Small lane-aligned tensor: single full-extent block, still no padding.
        for c in (2048, 1024, 512, 256, 128):
            if total % c == 0:
                cols = c
                break

    if cols is not None:
        padded = total
    else:
        # Ragged element count: pad once to a (row_mult x 128)-aligned slab.
        # TODO(synk): a masked tail store in the last grid step would avoid this pass.
        cols = 128
        chunk = row_mult * cols
        padded = -(-total // chunk) * chunk
        flat = jnp.pad(flat, (0, padded - total))

    rows = padded // cols

    # Largest block_rows that (a) divides rows, (b) is sublane aligned and
    # (c) keeps a block <= target_block_bytes, preferring >= 4 grid steps
    # (two per TensorCore on v7x).
    if rows % row_mult == 0:
        max_block_rows = max(row_mult, target_block_bytes // (cols * itemsize))
        if rows >= 4 * row_mult:
            max_block_rows = min(max_block_rows,
                                 max(row_mult, (rows // 4) // row_mult * row_mult))
        block_rows = row_mult
        d = row_mult
        limit = min(rows, max_block_rows)
        while d <= limit:
            if rows % d == 0:
                block_rows = d
            d += row_mult
    else:
        # Only reached for small tensors: full-extent block is allowed.
        block_rows = rows

    x2d = flat.reshape(rows, cols)

    out2d = pl.pallas_call(
        _h_sigmoid_kernel,
        grid=(rows // block_rows,),
        in_specs=[pl.BlockSpec((block_rows, cols), lambda i: (i, 0))],
        out_specs=pl.BlockSpec((block_rows, cols), lambda i: (i, 0)),
        out_shape=jax.ShapeDtypeStruct((rows, cols), dtype),
        input_output_aliases={0: 0},
        compiler_params=pltpu.CompilerParams(
            dimension_semantics=("parallel",),
            vmem_limit_bytes=vmem_limit_bytes),
    )(x2d)

    out = out2d.reshape(-1)
    if padded != total:
        out = out[:total]
    return out.reshape(orig_shape)


def reference(x):
    xf = x.astype(jnp.float32)
    return jnp.clip(xf + 3.0, 0.0, 6.0) / 6.0


if __name__ == "__main__":
    key = jax.random.PRNGKey(0)
    # Scale so samples land in all three regimes of relu6 (clip low / linear / clip high).
    x = 4.0 * jax.random.normal(key, (2, 4, 16, 16), jnp.float32)

    # Compute the reference before the kernel (the kernel may donate its input slab).
    ref = reference(x)

    out = jax.block_until_ready(jax.jit(h_sigmoid)(x))

    assert out.shape == x.shape, out.shape
    assert out.dtype == x.dtype, out.dtype
    err = float(jnp.max(jnp.abs(out.astype(jnp.float32) - ref)))
    assert err <= 2e-6, err

    print("KERNEL_OK")
</pallas_src>

<mosaic_0001>
module attributes {stable_mosaic.version = 11 : i64} {
  func.func @_h_sigmoid_kernel(%arg0: i32, %arg1: memref<8x256xf32, #tpu.memory_space<vmem>>, %arg2: memref<8x256xf32, #tpu.memory_space<vmem>>) attributes {dimension_semantics = [#tpu.dimension_semantics<parallel>], iteration_bounds = array<i64: 1>, scalar_prefetch = 0 : i64, scratch_operands = 0 : i64, tpu.core_type = #tpu.core_type<tc>, window_params = [{transform_indices = @transform_0, window_bounds = array<i64: 8, 256>}, {transform_indices = @transform_1, window_bounds = array<i64: 8, 256>}]} {
    %c0 = arith.constant 0 : index
    %c0_0 = arith.constant 0 : index
    %0 = vector.load %arg1[%c0, %c0_0] : memref<8x256xf32, #tpu.memory_space<vmem>>, vector<8x256xf32>
    %cst = arith.constant 3.000000e+00 : f32
    %1 = vector.broadcast %cst : f32 to vector<8x256xf32>
    %2 = arith.addf %0, %1 : vector<8x256xf32>
    %cst_1 = arith.constant 0.000000e+00 : f32
    %3 = vector.broadcast %cst_1 : f32 to vector<8x256xf32>
    %4 = arith.maximumf %2, %3 : vector<8x256xf32>
    %cst_2 = arith.constant 6.000000e+00 : f32
    %5 = vector.broadcast %cst_2 : f32 to vector<8x256xf32>
    %6 = arith.minimumf %4, %5 : vector<8x256xf32>
    %cst_3 = arith.constant 0.166666672 : f32
    %7 = vector.broadcast %cst_3 : f32 to vector<8x256xf32>
    %8 = arith.mulf %6, %7 : vector<8x256xf32>
    %c0_4 = arith.constant 0 : index
    %c0_5 = arith.constant 0 : index
    %9 = vector.load %arg2[%c0_4, %c0_5] : memref<8x256xf32, #tpu.memory_space<vmem>>, vector<8x256xf32>
    tpu.vector_store %arg2[%c0_4, %c0_5], %8 {strides = array<i32>} : memref<8x256xf32, #tpu.memory_space<vmem>>, vector<8x256xf32>,
    return
  }
  func.func @transform_0(%arg0: i32) -> (i32, i32) {
    %c0_i32 = arith.constant 0 : i32
    %c0_i32_0 = arith.constant 0 : i32
    return %arg0, %c0_i32 : i32, i32
  }
  func.func @transform_1(%arg0: i32) -> (i32, i32) {
    %c0_i32 = arith.constant 0 : i32
    %c0_i32_0 = arith.constant 0 : i32
    return %arg0, %c0_i32 : i32, i32
  }
}

</mosaic_0001>

<bundles_post_ra>
// kernel: h_sigmoid.1
= control target key start
LH: loop header
LB: loop body
LE: loop exit
PB: predicated region body
PF: predicated region fallthrough
CT: control target
= control target key end

     0   :  { %s46_s0 = inlined_call_operand.vmem [shape: f32[8,256], index: 0, kind: input, shape index: {}, may-alias: {0,1}]   ;;  %s47_s1 = inlined_call_operand.vmem [shape: f32[8,256], index: 1, kind: output, shape index: {}, may-alias: {0,1}]  }
   0x1   :  { %v8_v0 = vld [vmem:[%s46_s0] sm:$0xff]  ;;  %v9_v1 = vld [vmem:[%s46_s0 + $0x8] sm:$0xff] }
   0x2   :  { %v10_v2 = vadd.f32 3.0, %v8_v0  ;;  %v11_v3 = vadd.f32 3.0, %v9_v1 }
   0x4   :  { %v12_v4 = vmax.f32 %v10_v2, 0.0  ;;  %v13_v5 = vmax.f32 %v11_v3, 0.0 }
   0x6   :  { %v14_v6 = vmin.f32 %v12_v4, 6.0  ;;  %v15_v7 = vmin.f32 %v13_v5, 6.0 }
   0x8   :  { %v16_v8 = vmul.f32 0.16666667, %v14_v6  ;;  %v17_v9 = vmul.f32 0.16666667, %v15_v7 }
   0xa   :  { %18 = vst [vmem:[%s47_s1] sm:$0xff] %v16_v8 }
   0xb   :  { %19 = vst [vmem:[%s47_s1 + $0x8] sm:$0xff] %v17_v9 }

</bundles_post_ra>
